<compile_context>
chip_gen: v6e
topology: v6e:2x2x1
jax: 0.10.0
libtpu: 0.0.40
codegen_flags: <defaults>
</compile_context>

<pallas_src>
import jax
import jax.numpy as jnp
from jax.experimental import pallas as pl
from jax.experimental.pallas import tpu as pltpu


def _round_up(x, m):
    return (x + m - 1) // m * m


def _sublane_tile(dtype):
    # Sub-32-bit dtypes pack along sublanes: f32 -> 8, bf16 -> 16, int8 -> 32.
    return {4: 8, 2: 16, 1: 32}.get(jnp.dtype(dtype).itemsize, 8)


def _fusion_kernel(w_ref, img_ref, txt_ref, out_ref):
    # w_ref: (2,) already-softmaxed fusion weights living in SMEM (f32).
    w0 = w_ref[0]
    w1 = w_ref[1]
    out_ref[...] = (w0 * img_ref[...] + w1 * txt_ref[...]).astype(out_ref.dtype)


def learnable_weight_fusion(weights, image_features, text_features, *,
                            target_block_bytes=2 * 1024 * 1024,
                            min_pallas_elems=1 << 16):
    """Pallas equivalent of LearnableWeightFusion.forward.

    weights: (2,) raw (pre-softmax) parameters.
    image_features, text_features: (B, D) arrays with identical shape/dtype.
    """
    assert image_features.shape == text_features.shape
    B, D = image_features.shape
    out_dtype = image_features.dtype
    n = B * D

    # Trivial 2-way softmax hoisted out of the kernel.
    w = jax.nn.softmax(weights.astype(jnp.float32), axis=0)

    # Small-input fast path: custom-call dispatch would dominate the work.
    if n < min_pallas_elems:
        fused = (w[0] * image_features.astype(jnp.float32)
                 + w[1] * text_features.astype(jnp.float32))
        return fused.astype(out_dtype)

    # Choose a layout WITHOUT any extra HBM pad/slice passes:
    #   * D % 128 == 0  -> native (B, D) is already lane dense.
    #   * n % 128 == 0  -> free contiguous reshape to (n // lane_w, lane_w).
    #   * otherwise     -> native (B, D) with full-extent last dim; Pallas
    #                      masks partial blocks, no extra HBM traffic.
    reshaped = False
    if D % 128 == 0:
        rows, lane_w = B, D
        img2d, txt2d = image_features, text_features
    elif n % 128 == 0:
        lane_w = 512 if n % 512 == 0 else (256 if n % 256 == 0 else 128)
        rows = n // lane_w
        img2d = image_features.reshape(rows, lane_w)
        txt2d = text_features.reshape(rows, lane_w)
        reshaped = True
    else:
        rows, lane_w = B, D
        img2d, txt2d = image_features, text_features

    itemsize = jnp.dtype(out_dtype).itemsize
    sub = _sublane_tile(out_dtype)

    if rows <= sub:
        tb = rows                                  # full extent -> single block
    else:
        # Rows per block: respect the per-array VMEM budget, keep a multiple
        # of the dtype sublane tile, and guarantee >= 2 tiles so the
        # "parallel" grid axis can shard across both v7x TensorCores.
        cap = max(sub, (target_block_bytes // (lane_w * itemsize)) // sub * sub)
        half = _round_up(pl.cdiv(rows, 2), sub)
        tb = max(sub, min(cap, half))

    num_tiles = pl.cdiv(rows, tb)

    out2d = pl.pallas_call(
        _fusion_kernel,
        out_shape=jax.ShapeDtypeStruct((rows, lane_w), out_dtype),
        grid=(num_tiles,),
        in_specs=[
            pl.BlockSpec(memory_space=pltpu.MemorySpace.SMEM),   # (2,) weights
            pl.BlockSpec((tb, lane_w), lambda i: (i, 0)),        # image tile
            pl.BlockSpec((tb, lane_w), lambda i: (i, 0)),        # text tile
        ],
        out_specs=pl.BlockSpec((tb, lane_w), lambda i: (i, 0)),
        compiler_params=pltpu.CompilerParams(
            dimension_semantics=("parallel",)),
    )(w, img2d, txt2d)

    if reshaped:
        out2d = out2d.reshape(B, D)
    return out2d


if __name__ == "__main__":
    key = jax.random.PRNGKey(0)
    k1, k2, k3, k4, k5, k6, k7, k8 = jax.random.split(key, 8)

    # nn.Parameter(torch.FloatTensor([0.5, 0.5])) — deterministic init
    fusion_weights = jnp.array([0.5, 0.5], dtype=jnp.float32)
    w_ref = jax.nn.softmax(fusion_weights)

    # Case 1: module-typical tiny input (batch=2, feature_dim=32) -> jnp fast path.
    img = jax.random.normal(k1, (2, 32), jnp.float32)
    txt = jax.random.normal(k2, (2, 32), jnp.float32)
    out = jax.block_until_ready(learnable_weight_fusion(fusion_weights, img, txt))
    ref = w_ref[0] * img + w_ref[1] * txt
    assert out.shape == (2, 32)
    assert jnp.allclose(out, ref, atol=1e-5, rtol=1e-5)

    # Case 2: lane-dense native layout, multi-tile Pallas grid.
    img = jax.random.normal(k3, (256, 512), jnp.float32)
    txt = jax.random.normal(k4, (256, 512), jnp.float32)
    out = jax.block_until_ready(learnable_weight_fusion(fusion_weights, img, txt))
    ref = w_ref[0] * img + w_ref[1] * txt
    assert out.shape == (256, 512)
    assert jnp.allclose(out, ref, atol=1e-5, rtol=1e-5)

    # Case 3: ragged D (D % 128 != 0) — native layout, full-extent last dim,
    # masked trailing partial block, zero pad/slice passes.
    img = jax.random.normal(k5, (40, 300), jnp.float32)
    txt = jax.random.normal(k6, (40, 300), jnp.float32)
    out = jax.block_until_ready(
        learnable_weight_fusion(fusion_weights, img, txt, min_pallas_elems=0))
    ref = w_ref[0] * img + w_ref[1] * txt
    assert out.shape == (40, 300)
    assert jnp.allclose(out, ref, atol=1e-5, rtol=1e-5)

    # Case 4: bf16 features (halves HBM traffic); f32 scalars broadcast in-kernel.
    img = jax.random.normal(k7, (128, 256), jnp.bfloat16)
    txt = jax.random.normal(k8, (128, 256), jnp.bfloat16)
    out = jax.block_until_ready(
        learnable_weight_fusion(fusion_weights, img, txt, min_pallas_elems=0))
    ref = (w_ref[0] * img.astype(jnp.float32)
           + w_ref[1] * txt.astype(jnp.float32)).astype(jnp.bfloat16)
    assert out.shape == (128, 256) and out.dtype == jnp.bfloat16
    assert jnp.allclose(out.astype(jnp.float32), ref.astype(jnp.float32),
                        atol=2e-2, rtol=2e-2)

    print("KERNEL_OK")
</pallas_src>

<mosaic_0001>
module attributes {stable_mosaic.version = 11 : i64} {
  func.func @_fusion_kernel(%arg0: i32, %arg1: memref<2xf32, #tpu.memory_space<smem>>, %arg2: memref<128x512xf32, #tpu.memory_space<vmem>>, %arg3: memref<128x512xf32, #tpu.memory_space<vmem>>, %arg4: memref<128x512xf32, #tpu.memory_space<vmem>>) attributes {dimension_semantics = [#tpu.dimension_semantics<parallel>], iteration_bounds = array<i64: 2>, scalar_prefetch = 0 : i64, scratch_operands = 0 : i64, tpu.core_type = #tpu.core_type<tc>, window_params = [{transform_indices = @transform_0, window_bounds = array<i64: 2>}, {transform_indices = @transform_1, window_bounds = array<i64: 128, 512>}, {transform_indices = @transform_2, window_bounds = array<i64: 128, 512>}, {transform_indices = @transform_3, window_bounds = array<i64: 128, 512>}]} {
    %c0 = arith.constant 0 : index
    %0 = memref.load %arg1[%c0] : memref<2xf32, #tpu.memory_space<smem>>
    %c1 = arith.constant 1 : index
    %1 = memref.load %arg1[%c1] : memref<2xf32, #tpu.memory_space<smem>>
    %c0_0 = arith.constant 0 : index
    %c0_1 = arith.constant 0 : index
    %2 = vector.load %arg2[%c0_0, %c0_1] : memref<128x512xf32, #tpu.memory_space<vmem>>, vector<128x512xf32>
    %3 = vector.broadcast %0 : f32 to vector<128x512xf32>
    %4 = arith.mulf %3, %2 : vector<128x512xf32>
    %c0_2 = arith.constant 0 : index
    %c0_3 = arith.constant 0 : index
    %5 = vector.load %arg3[%c0_2, %c0_3] : memref<128x512xf32, #tpu.memory_space<vmem>>, vector<128x512xf32>
    %6 = vector.broadcast %1 : f32 to vector<128x512xf32>
    %7 = arith.mulf %6, %5 : vector<128x512xf32>
    %8 = arith.addf %4, %7 : vector<128x512xf32>
    %c0_4 = arith.constant 0 : index
    %c0_5 = arith.constant 0 : index
    %9 = vector.load %arg4[%c0_4, %c0_5] : memref<128x512xf32, #tpu.memory_space<vmem>>, vector<128x512xf32>
    tpu.vector_store %arg4[%c0_4, %c0_5], %8 {strides = array<i32>} : memref<128x512xf32, #tpu.memory_space<vmem>>, vector<128x512xf32>,
    return
  }
  func.func @transform_0(%arg0: i32) -> i32 {
    %c0_i32 = arith.constant 0 : i32
    %c0_i32_0 = arith.constant 0 : i32
    return %c0_i32 : i32
  }
  func.func @transform_1(%arg0: i32) -> (i32, i32) {
    %c0_i32 = arith.constant 0 : i32
    %c0_i32_0 = arith.constant 0 : i32
    return %arg0, %c0_i32 : i32, i32
  }
  func.func @transform_2(%arg0: i32) -> (i32, i32) {
    %c0_i32 = arith.constant 0 : i32
    %c0_i32_0 = arith.constant 0 : i32
    return %arg0, %c0_i32 : i32, i32
  }
  func.func @transform_3(%arg0: i32) -> (i32, i32) {
    %c0_i32 = arith.constant 0 : i32
    %c0_i32_0 = arith.constant 0 : i32
    return %arg0, %c0_i32 : i32, i32
  }
}

</mosaic_0001>

<bundles_post_ra>
// kernel: tpu_custom_call.1
= control target key start
LH: loop header
LB: loop body
LE: loop exit
PB: predicated region body
PF: predicated region fallthrough
CT: control target
= control target key end

     0   :  { %8 = vsyncpa [#allocation5], 0  ;;  %s1589_s0 = inlined_call_operand.hbm [shape: f32[2], index: 0, kind: input, shape index: {}]   ;;  %s1590_s1 = inlined_call_operand.hbm [shape: f32[256,512], index: 1, kind: input, shape index: {}]   ;;  %s1591_s2 = inlined_call_operand.hbm [shape: f32[256,512], index: 2, kind: input, shape index: {}]   ;;  %s1592_s3 = inlined_call_operand.hbm [shape: f32[256,512], index: 3, kind: output, shape index: {}]  }
   0x1   :  { %9 = vsyncpa [#allocation3], 0 }
   0x2   :  { %11 = vsyncpa [#allocation3 + $0x1], 0 }
   0x3   :  { %12 = vsyncpa [#allocation8], 0 }
   0x4   :  { %14 = vsyncpa [#allocation8 + $0x1], 0 }
   0x5   :  { %15 = vsyncpa [#allocation4], 0 }
   0x6   :  { %17 = vsyncpa [#allocation4 + $0x1], 0  ;;  %s1022_s12 = smov 0   ;;  %s1024_s13 = smov 0  }
   0x7   :  { %s1026_s14 = smov 0   ;;  %s1028_s15 = smov 0  }
   0x8 LB: > { %s1043_s16 = sadd.s32 4294967295, %s992_s15   ;;  %s757_s17 = sadd.s32 4294967294, %s992_s15   ;;  %s992_s15 = sphi %s1028_s15, %s1612_s15   ;;  %s988_s14 = sphi %s1026_s14, %s1611_s14   ;;  %s984_s13 = sphi %s1024_s13, %s1610_s13   ;;  %s980_s12 = sphi %s1022_s12, %s1609_s12  }
   0x9   : > { %s1047_s18 = sadd.s32 1, %s992_s15   ;;  %s51_s19 = sadd.s32 1, %s988_s14 }
   0xa   : > { %s48_s20 = ssub.s32 %s992_s15, %s1047_s18  ;;  %p58_p0 = scmp.ne.s32.totalorder %s988_s14, %s984_s13 }
   0xb   : > { %p49_p1 = scmp.eq.s32.totalorder %s48_s20, 0  ;;  %p59_p2 = scmp.eq.s32.totalorder %s992_s15, 0 }
   0xc   : > { %p64_p3 = scmp.ne.s32.totalorder %s984_s13, %s980_s12  ;;  %p1593_p4 = scmp.eq.s32.totalorder %s1043_s16, 0 }
   0xd   : > { %s1059_s21 = scalar_select %p49_p1, %s988_s14, %s51_s19  }
   0xe   : > { %p1061_p5 = por %p59_p2, %p58_p0  ;;  %p1067_p6 = por %p1593_p4, %p64_p3 }
   0xf   : > { %p114_p7 = scmp.eq.s32.totalorder %s1043_s16, 1  ;;  %p120_p8 = scmp.eq.s32.totalorder %s757_s17, 1 }
  0x10   : > { %s1597_s23 = scalar_select %p1067_p6, 1, 0 }
  0x11   : > { %p758_p9 = scmp.ge.s32.totalorder %s992_s15, 1  ;;  %p127_p10 = scmp.lt.s32.totalorder %s992_s15, 3 }
  0x12   : > { %p1074_p11 = por %p114_p7, %p58_p0  ;;  %p1078_p12 = por %p120_p8, %p64_p3 }
  0x13   : > { %p1082_p13 = pnand %p758_p9, %p127_p10  ;;  %p813_p4 = scmp.lt.s32.totalorder %s992_s15, 2 }
  0x14   : > { %s1598_s24 = scalar_select %p1074_p11, 1, 0 }
  0x15   : > { %s1599_s25 = scalar_select %p1078_p12, 1, 0 }
  0x16   : > { %p797_p2 = pneg %p1082_p13  ;;  %s1091_s27 = sand.u32 1, %s988_s14  }
  0x17   : > { %s782_s28 = sshll.u32 %s992_s15, 13  ;;  %p1601_p0 = scmp.eq.s32.totalorder %s1043_s16, 0 }
  0x18   : > { %p1098_p7 = pnand %p813_p4, %p1061_p5  ;;  %s761_s30 = sshll.u32 %s1091_s27, 9 }
  0x19   : > { %p798_p3 = pnand %p797_p2, %p1601_p0  ;;  %s994_s4 = smov [#allocation2]  }
  0x1a   : > { %s1111_s9 = scalar_lea.hbm %s1590_s1, %s782_s28  ;;  %s153_s10 = scalar_lea.vmem [#allocation6], %s761_s30 }
  0x1b   : > { %800 = dma.hbm_to_smem (!%p798_p3), %s1589_s0, 16, %s994_s4, [#allocation5]  }
  0x1c   : > { %s161_s11 = sshll.u32 %s153_s10, 4  ;;  %s150_s17 = scalar_lea.sflag [#allocation3], %s1091_s27  ;;  %s1115_s11 = int_to_ptr.vmem [resolvable:$true] %s161_s11 }
  0x1d   : > { %s864_s19 = scalar_lea.hbm %s1111_s9, 8192  ;;  %p866_p5 = pneg %p1098_p7 }
  0x1e   : > { %p865_p4 = scmp.ne.s32.totalorder %s1111_s9, %s864_s19  ;;  %s869_s4 = scalar_lea.hbm %s1590_s1, 16384 }
  0x1f   : > { %p870_p10 = scmp.lt.s32.totalorder %s1111_s9, %s1590_s1  ;;  %p871_p2 = scmp.lt.s32.totalorder %s869_s4, %s864_s19 }
  0x20   : > { %p867_p8 = pnand %p866_p5, %p865_p4 }
  0x21   : > { %p872_p0 = por %p871_p2, %p870_p10 }
  0x22   : > { %p868_p9 = pneg %p867_p8 }
  0x24   : > { %p873_p3 = pnand %p872_p0, %p868_p9 }
  0x26   : > { %876 = shalt.err (!%p873_p3)
}
  0x27   : > { %s877_s7 = scalar_lea.vmem %s1115_s11, 8192  ;;  %s995_s8 = smov [#allocation6]  }
  0x28   : > { %p878_p1 = scmp.ne.s32.totalorder %s1115_s11, %s877_s7  ;;  %s882_s10 = sshll.u32 %s995_s8, 4  ;;  %s883_s10 = int_to_ptr.vmem [resolvable:$false] %s882_s10 }
  0x29   : > { %s884_s20 = scalar_lea.vmem %s883_s10, 16384  ;;  %p885_p12 = scmp.lt.s32.totalorder %s1115_s11, %s883_s10 }
  0x2a   : > { %p880_p4 = pnand %p878_p1, %p866_p5  ;;  %p886_p11 = scmp.lt.s32.totalorder %s884_s20, %s877_s7 }
  0x2c   : > { %p881_p8 = pneg %p880_p4  ;;  %p887_p6 = por %p886_p11, %p885_p12 }
  0x2e   : > { %p888_p10 = pnand %p887_p6, %p881_p8 }
  0x30   : > { %891 = shalt.err (!%p888_p10)
}
  0x31   : > { %s996_s19 = smov 512   ;;  %s997_s22 = smov 32  }
  0x32   : > { %804 = dma.hbm_to_vmem [thread:$0]  (!%p1098_p7), %s1111_s9, 8192, %s1115_s11, %s150_s17, %s996_s19, %s996_s19, %s997_s22  }
  0x33   : > { %s1152_s6 = scalar_lea.hbm %s1591_s2, %s782_s28  ;;  %s175_s7 = scalar_lea.vmem [#allocation7], %s761_s30 }
  0x34   : > { %s183_s8 = sshll.u32 %s175_s7, 4  ;;  %s172_s10 = scalar_lea.sflag [#allocation8], %s1091_s27  ;;  %s1156_s8 = int_to_ptr.vmem [resolvable:$true] %s183_s8 }
  0x35   : > { %s892_s20 = scalar_lea.hbm %s1152_s6, 8192  ;;  %s897_s28 = scalar_lea.hbm %s1591_s2, 16384 }
  0x36   : > { %p893_p6 = scmp.ne.s32.totalorder %s1152_s6, %s892_s20  ;;  %p898_p1 = scmp.lt.s32.totalorder %s1152_s6, %s1591_s2 }
  0x37   : > { %p899_p9 = scmp.lt.s32.totalorder %s897_s28, %s892_s20 }
  0x38   : > { %p895_p11 = pnand %p893_p6, %p866_p5 }
  0x39   : > { %p900_p2 = por %p899_p9, %p898_p1 }
  0x3a   : > { %p896_p12 = pneg %p895_p11 }
  0x3c   : > { %p901_p0 = pnand %p900_p2, %p896_p12 }
  0x3e   : > { %904 = shalt.err (!%p901_p0)
}
  0x3f   : > { %s905_s27 = scalar_lea.vmem %s1156_s8, 8192  ;;  %s998_s30 = smov [#allocation7]  }
  0x40   : > { %p906_p3 = scmp.ne.s32.totalorder %s1156_s8, %s905_s27  ;;  %s910_s5 = sshll.u32 %s998_s30, 4  ;;  %s911_s5 = int_to_ptr.vmem [resolvable:$false] %s910_s5 }
  0x41   : > { %s912_s7 = scalar_lea.vmem %s911_s5, 16384  ;;  %p913_p10 = scmp.lt.s32.totalorder %s1156_s8, %s911_s5 }
  0x42   : > { %p908_p4 = pnand %p906_p3, %p866_p5  ;;  %p914_p6 = scmp.lt.s32.totalorder %s912_s7, %s905_s27 }
  0x44   : > { %p909_p8 = pneg %p908_p4  ;;  %p915_p11 = por %p914_p6, %p913_p10 }
  0x46   : > { %p916_p1 = pnand %p915_p11, %p909_p8 }
  0x48   : > { %919 = shalt.err (!%p916_p1)
}
  0x49   : > { %807 = dma.hbm_to_vmem [thread:$0]  (!%p1098_p7), %s1152_s6, 8192, %s1156_s8, %s172_s10, %s996_s19, %s996_s19, %s997_s22  }
  0x4a   : > { %195 = sbr.rel (%p1082_p13) target bundleno = 163 (0xa3), region = 32  ;;  %p1603_p5 = scmp.eq.s32.totalorder (!%p1082_p13), %s1043_s16, 0 }
  0x4f   : > { %963 = dma.done.wait (%p1603_p5), [#allocation5], 16   ;;  %p1604_p12 = pmov %p1603_p5 }
  0x50   : > { %s1191_s20 = sand.u32 1, %s984_s13   ;;  %p1605_p7 = scmp.ne.s32.totalorder %s1597_s23, 0 }
  0x51   : > { %965 = vsyncadd (%p1604_p12), [#allocation5], 4294967280  ;;  %s1194_s29 = sshll.u32 %s1191_s20, 9  ;;  %s202_s9 = scalar_lea.sflag [#allocation3], %s1191_s20 }
  0x52   : > { %s1198_s19 = scalar_lea.vmem [#allocation6], %s1194_s29 }
  0x53   : > { %967 = dma.done.wait (%p1605_p7), %s202_s9, 8192  }
  0x54   : > { %969 = vsyncadd (%p1605_p7), %s202_s9, 4294959104  ;;  %s211_s26 = scalar_lea.sflag [#allocation8], %s1191_s20  ;;  %s1206_s22 = scalar_lea.vmem [#allocation7], %s1194_s29 }
  0x55   : > { %971 = dma.done.wait (%p1605_p7), %s211_s26, 8192  }
  0x56   : > { %973 = vsyncadd (%p1605_p7), %s211_s26, 4294959104 }
  0x57   : > { %219 = sfence }
  0x58   : > { %s246_s6 = sld [smem:[#allocation2]]  ;;  %v248_v0 = vld [vmem:[%s1198_s19] sm:$0xff]  ;;  %v249_v2 = vld [vmem:[%s1198_s19 + $0x8] sm:$0xff]  ;;  %v250_v4 = vld [vmem:[%s1198_s19 + $0x10] sm:$0xff]  ;;  %s1254_s23 = scalar_lea.vmem [#allocation9], %s1194_s29 }
  0x59   : > { %s774_s8 = sld [smem:[#allocation2 + $0x1]]  ;;  %v377_v1 = vld [vmem:[%s1206_s22] sm:$0xff]  ;;  %v378_v3 = vld [vmem:[%s1206_s22 + $0x8] sm:$0xff]  ;;  %v379_v5 = vld [vmem:[%s1206_s22 + $0x10] sm:$0xff]  ;;  %s786_s10 = sshll.u32 %s1043_s16, 13 }
  0x5a   : > { %v251_v6 = vld [vmem:[%s1198_s19 + $0x18] sm:$0xff]  ;;  %v252_v9 = vld [vmem:[%s1198_s19 + $0x20] sm:$0xff]  ;;  %v253_v11 = vld [vmem:[%s1198_s19 + $0x28] sm:$0xff]  ;;  %s649_s11 = sshll.u32 %s1254_s23, 4  ;;  %s1540_s17 = scalar_lea.hbm %s1592_s3, %s786_s10  ;;  %s1542_s11 = int_to_ptr.vmem [resolvable:$true] %s649_s11 }
  0x5b   : > { %v380_v7 = vld [vmem:[%s1206_s22 + $0x18] sm:$0xff]  ;;  %v381_v10 = vld [vmem:[%s1206_s22 + $0x20] sm:$0xff]  ;;  %v382_v16 = vld [vmem:[%s1206_s22 + $0x28] sm:$0xff]  ;;  %s635_s4 = scalar_lea.sflag [#allocation4], %s1191_s20  ;;  %s920_s27 = scalar_lea.vmem %s1542_s11, 8192 }
  0x5c   : > { %v254_v21 = vld [vmem:[%s1198_s19 + $0x30] sm:$0xff]  ;;  %v255_v27 = vld [vmem:[%s1198_s19 + $0x38] sm:$0xff]  ;;  %v256_v29 = vld [vmem:[%s1198_s19 + $0x40] sm:$0xff]  ;;  %p921_p13 = scmp.ne.s32.totalorder %s1542_s11, %s920_s27  ;;  %p1606_p9 = scmp.ne.s32.totalorder %s1598_s24, 0 }
  0x5d   : > { %v383_v22 = vld [vmem:[%s1206_s22 + $0x30] sm:$0xff]  ;;  %v384_v28 = vld [vmem:[%s1206_s22 + $0x38] sm:$0xff]  ;;  %v385_v34 = vld [vmem:[%s1206_s22 + $0x40] sm:$0xff]  ;;  %s999_s30 = smov [#allocation9]  }
  0x5e   : > { %v1220_v8 = vstv %s246_s6  ;;  %v257_v35 = vld [vmem:[%s1198_s19 + $0x48] sm:$0xff]  ;;  %v258_v41 = vld [vmem:[%s1198_s19 + $0x50] sm:$0xff]  ;;  %v259_v43 = vld [vmem:[%s1198_s19 + $0x58] sm:$0xff]  ;;  %p922_p2 = pnand %p921_p13, %p1606_p9  ;;  %s924_s5 = sshll.u32 %s999_s30, 4  ;;  %s925_s5 = int_to_ptr.vmem [resolvable:$false] %s924_s5 }
  0x5f   : > { %v313_v12 = vmul.f32 %v1220_v8, %v248_v0  ;;  %v1226_v13 = vstv %s774_s8  ;;  %v314_v14 = vmul.f32 %v1220_v8, %v249_v2  ;;  %v315_v15 = vmul.f32 %v1220_v8, %v250_v4  ;;  %v386_v36 = vld [vmem:[%s1206_s22 + $0x48] sm:$0xff]  ;;  %v387_v42 = vld [vmem:[%s1206_s22 + $0x50] sm:$0xff]  ;;  %v388_v48 = vld [vmem:[%s1206_s22 + $0x58] sm:$0xff]  ;;  %s926_s7 = scalar_lea.vmem %s925_s5, 16384  ;;  %p927_p3 = scmp.lt.s32.totalorder %s1542_s11, %s925_s5 }
  0x60   : > { %v442_v17 = vmul.f32 %v1226_v13, %v377_v1  ;;  %v443_v18 = vmul.f32 %v1226_v13, %v378_v3  ;;  %v444_v19 = vmul.f32 %v1226_v13, %v379_v5  ;;  %v316_v20 = vmul.f32 %v1220_v8, %v251_v6  ;;  %v260_v49 = vld [vmem:[%s1198_s19 + $0x60] sm:$0xff]  ;;  %v261_v55 = vld [vmem:[%s1198_s19 + $0x68] sm:$0xff]  ;;  %v262_v61 = vld [vmem:[%s1198_s19 + $0x70] sm:$0xff]  ;;  %p923_p0 = pneg %p922_p2  ;;  %p928_p4 = scmp.lt.s32.totalorder %s926_s7, %s920_s27 }
  0x61   : > { %v445_v23 = vmul.f32 %v1226_v13, %v380_v7  ;;  %v317_v24 = vmul.f32 %v1220_v8, %v252_v9  ;;  %v446_v25 = vmul.f32 %v1226_v13, %v381_v10  ;;  %v318_v26 = vmul.f32 %v1220_v8, %v253_v11  ;;  %v389_v54 = vld [vmem:[%s1206_s22 + $0x60] sm:$0xff]  ;;  %v390_v56 = vld [vmem:[%s1206_s22 + $0x68] sm:$0xff]  ;;  %v391_v62 = vld [vmem:[%s1206_s22 + $0x70] sm:$0xff] }
  0x62   : > { %v506_v30 = vadd.f32 %v442_v17, %v313_v12  ;;  %v507_v31 = vadd.f32 %v443_v18, %v314_v14  ;;  %v508_v32 = vadd.f32 %v444_v19, %v315_v15  ;;  %v447_v33 = vmul.f32 %v1226_v13, %v382_v16  ;;  %v263_v63 = vld [vmem:[%s1198_s19 + $0x78] sm:$0xff]  ;;  %v264_v5 = vld [vmem:[%s1198_s19 + $0x80] sm:$0xff]  ;;  %v265_v12 = vld [vmem:[%s1198_s19 + $0x88] sm:$0xff]  ;;  %p929_p8 = por %p928_p4, %p927_p3 }
  0x63   : > { %v509_v37 = vadd.f32 %v445_v23, %v316_v20  ;;  %v510_v38 = vadd.f32 %v446_v25, %v317_v24  ;;  %v319_v39 = vmul.f32 %v1220_v8, %v254_v21  ;;  %v448_v40 = vmul.f32 %v1226_v13, %v383_v22  ;;  %v392_v4 = vld [vmem:[%s1206_s22 + $0x78] sm:$0xff]  ;;  %v393_v11 = vld [vmem:[%s1206_s22 + $0x80] sm:$0xff]  ;;  %v394_v14 = vld [vmem:[%s1206_s22 + $0x88] sm:$0xff] }
  0x64   : > { %570 = vst [vmem:[%s1254_s23] sm:$0xff] %v506_v30  ;;  %571 = vst [vmem:[%s1254_s23 + $0x8] sm:$0xff] %v507_v31  ;;  %v511_v44 = vadd.f32 %v447_v33, %v318_v26  ;;  %v320_v45 = vmul.f32 %v1220_v8, %v255_v27  ;;  %v449_v46 = vmul.f32 %v1226_v13, %v384_v28  ;;  %v266_v19 = vld [vmem:[%s1198_s19 + $0x90] sm:$0xff]  ;;  %v267_v21 = vld [vmem:[%s1198_s19 + $0x98] sm:$0xff]  ;;  %p930_p10 = pnand %p929_p8, %p923_p0 }
  0x65   : > { %572 = vst [vmem:[%s1254_s23 + $0x10] sm:$0xff] %v508_v32  ;;  %v321_v47 = vmul.f32 %v1220_v8, %v256_v29  ;;  %573 = vst [vmem:[%s1254_s23 + $0x18] sm:$0xff] %v509_v37  ;;  %v512_v50 = vadd.f32 %v448_v40, %v319_v39  ;;  %v450_v51 = vmul.f32 %v1226_v13, %v385_v34  ;;  %v395_v20 = vld [vmem:[%s1206_s22 + $0x90] sm:$0xff]  ;;  %v396_v26 = vld [vmem:[%s1206_s22 + $0x98] sm:$0xff] }
  0x66   : > { %574 = vst [vmem:[%s1254_s23 + $0x20] sm:$0xff] %v510_v38  ;;  %v322_v52 = vmul.f32 %v1220_v8, %v257_v35  ;;  %v451_v53 = vmul.f32 %v1226_v13, %v386_v36  ;;  %575 = vst [vmem:[%s1254_s23 + $0x28] sm:$0xff] %v511_v44  ;;  %v513_v57 = vadd.f32 %v449_v46, %v320_v45  ;;  %v268_v27 = vld [vmem:[%s1198_s19 + $0xa0] sm:$0xff]  ;;  %v269_v33 = vld [vmem:[%s1198_s19 + $0xa8] sm:$0xff] }
  0x67   : > { %v323_v58 = vmul.f32 %v1220_v8, %v258_v41  ;;  %v452_v59 = vmul.f32 %v1226_v13, %v387_v42  ;;  %v324_v60 = vmul.f32 %v1220_v8, %v259_v43  ;;  %576 = vst [vmem:[%s1254_s23 + $0x30] sm:$0xff] %v512_v50  ;;  %v514_v0 = vadd.f32 %v450_v51, %v321_v47  ;;  %v397_v32 = vld [vmem:[%s1206_s22 + $0xa0] sm:$0xff]  ;;  %v398_v34 = vld [vmem:[%s1206_s22 + $0xa8] sm:$0xff]  ;;  %v270_v39 = vld [vmem:[%s1198_s19 + $0xb0] sm:$0xff] }
  0x68   : > { %v515_v1 = vadd.f32 %v451_v53, %v322_v52  ;;  %v453_v2 = vmul.f32 %v1226_v13, %v388_v48  ;;  %v325_v3 = vmul.f32 %v1220_v8, %v260_v49  ;;  %577 = vst [vmem:[%s1254_s23 + $0x38] sm:$0xff] %v513_v57  ;;  %v454_v7 = vmul.f32 %v1226_v13, %v389_v54  ;;  %v399_v40 = vld [vmem:[%s1206_s22 + $0xb0] sm:$0xff]  ;;  %v271_v41 = vld [vmem:[%s1198_s19 + $0xb8] sm:$0xff]  ;;  %v272_v47 = vld [vmem:[%s1198_s19 + $0xc0] sm:$0xff] }
  0x69   : > { %v516_v6 = vadd.f32 %v452_v59, %v323_v58  ;;  %v326_v9 = vmul.f32 %v1220_v8, %v261_v55  ;;  %v455_v10 = vmul.f32 %v1226_v13, %v390_v56  ;;  %578 = vst [vmem:[%s1254_s23 + $0x40] sm:$0xff] %v514_v0  ;;  %v327_v16 = vmul.f32 %v1220_v8, %v262_v61  ;;  %v400_v46 = vld [vmem:[%s1206_s22 + $0xb8] sm:$0xff]  ;;  %v401_v52 = vld [vmem:[%s1206_s22 + $0xc0] sm:$0xff]  ;;  %v273_v53 = vld [vmem:[%s1198_s19 + $0xc8] sm:$0xff] }
  0x6a   : > { %579 = vst [vmem:[%s1254_s23 + $0x48] sm:$0xff] %v515_v1  ;;  %v517_v15 = vadd.f32 %v453_v2, %v324_v60  ;;  %v456_v17 = vmul.f32 %v1226_v13, %v391_v62  ;;  %v328_v18 = vmul.f32 %v1220_v8, %v263_v63  ;;  %v518_v22 = vadd.f32 %v454_v7, %v325_v3  ;;  %v402_v54 = vld [vmem:[%s1206_s22 + $0xc8] sm:$0xff]  ;;  %v274_v59 = vld [vmem:[%s1198_s19 + $0xd0] sm:$0xff]  ;;  %v275_v61 = vld [vmem:[%s1198_s19 + $0xd8] sm:$0xff] }
  0x6b   : > { %580 = vst [vmem:[%s1254_s23 + $0x50] sm:$0xff] %v516_v6  ;;  %v519_v23 = vadd.f32 %v455_v10, %v326_v9  ;;  %v457_v24 = vmul.f32 %v1226_v13, %v392_v4  ;;  %v329_v25 = vmul.f32 %v1220_v8, %v264_v5  ;;  %v458_v29 = vmul.f32 %v1226_v13, %v393_v11  ;;  %v403_v60 = vld [vmem:[%s1206_s22 + $0xd0] sm:$0xff]  ;;  %v404_v2 = vld [vmem:[%s1206_s22 + $0xd8] sm:$0xff]  ;;  %v276_v3 = vld [vmem:[%s1198_s19 + $0xe0] sm:$0xff] }
  0x6c   : > { %581 = vst [vmem:[%s1254_s23 + $0x58] sm:$0xff] %v517_v15  ;;  %v520_v28 = vadd.f32 %v456_v17, %v327_v16  ;;  %v330_v30 = vmul.f32 %v1220_v8, %v265_v12  ;;  %v459_v31 = vmul.f32 %v1226_v13, %v394_v14  ;;  %582 = vst [vmem:[%s1254_s23 + $0x60] sm:$0xff] %v518_v22  ;;  %v405_v9 = vld [vmem:[%s1206_s22 + $0xe0] sm:$0xff]  ;;  %v277_v10 = vld [vmem:[%s1198_s19 + $0xe8] sm:$0xff] }
  0x6d   : > { %583 = vst [vmem:[%s1254_s23 + $0x68] sm:$0xff] %v519_v23  ;;  %v521_v35 = vadd.f32 %v457_v24, %v328_v18  ;;  %v331_v36 = vmul.f32 %v1220_v8, %v266_v19  ;;  %v460_v37 = vmul.f32 %v1226_v13, %v395_v20  ;;  %v332_v38 = vmul.f32 %v1220_v8, %v267_v21  ;;  %v406_v11 = vld [vmem:[%s1206_s22 + $0xe8] sm:$0xff]  ;;  %v278_v17 = vld [vmem:[%s1198_s19 + $0xf0] sm:$0xff]  ;;  %v279_v19 = vld [vmem:[%s1198_s19 + $0xf8] sm:$0xff] }
  0x6e   : > { %584 = vst [vmem:[%s1254_s23 + $0x70] sm:$0xff] %v520_v28  ;;  %v522_v42 = vadd.f32 %v458_v29, %v329_v25  ;;  %v523_v43 = vadd.f32 %v459_v31, %v330_v30  ;;  %v461_v44 = vmul.f32 %v1226_v13, %v396_v26  ;;  %v333_v45 = vmul.f32 %v1220_v8, %v268_v27  ;;  %v407_v18 = vld [vmem:[%s1206_s22 + $0xf0] sm:$0xff]  ;;  %v408_v24 = vld [vmem:[%s1206_s22 + $0xf8] sm:$0xff]  ;;  %v280_v25 = vld [vmem:[%s1198_s19 + $0x100] sm:$0xff] }
  0x6f   : > { %585 = vst [vmem:[%s1254_s23 + $0x78] sm:$0xff] %v521_v35  ;;  %v524_v48 = vadd.f32 %v460_v37, %v331_v36  ;;  %v462_v49 = vmul.f32 %v1226_v13, %v397_v32  ;;  %v334_v50 = vmul.f32 %v1220_v8, %v269_v33  ;;  %v463_v51 = vmul.f32 %v1226_v13, %v398_v34  ;;  %v409_v30 = vld [vmem:[%s1206_s22 + $0x100] sm:$0xff]  ;;  %v281_v31 = vld [vmem:[%s1198_s19 + $0x108] sm:$0xff]  ;;  %v282_v37 = vld [vmem:[%s1198_s19 + $0x110] sm:$0xff] }
  0x70   : > { %586 = vst [vmem:[%s1254_s23 + $0x80] sm:$0xff] %v522_v42  ;;  %587 = vst [vmem:[%s1254_s23 + $0x88] sm:$0xff] %v523_v43  ;;  %v525_v55 = vadd.f32 %v461_v44, %v332_v38  ;;  %v335_v56 = vmul.f32 %v1220_v8, %v270_v39  ;;  %v464_v57 = vmul.f32 %v1226_v13, %v399_v40  ;;  %v410_v32 = vld [vmem:[%s1206_s22 + $0x108] sm:$0xff]  ;;  %v411_v38 = vld [vmem:[%s1206_s22 + $0x110] sm:$0xff] }
  0x71   : > { %v336_v58 = vmul.f32 %v1220_v8, %v271_v41  ;;  %588 = vst [vmem:[%s1254_s23 + $0x90] sm:$0xff] %v524_v48  ;;  %v526_v62 = vadd.f32 %v462_v49, %v333_v45  ;;  %v527_v63 = vadd.f32 %v463_v51, %v334_v50  ;;  %v465_v0 = vmul.f32 %v1226_v13, %v400_v46  ;;  %v283_v39 = vld [vmem:[%s1198_s19 + $0x118] sm:$0xff]  ;;  %v284_v45 = vld [vmem:[%s1198_s19 + $0x120] sm:$0xff]  ;;  %v285_v51 = vld [vmem:[%s1198_s19 + $0x128] sm:$0xff] }
  0x72   : > { %v337_v1 = vmul.f32 %v1220_v8, %v272_v47  ;;  %589 = vst [vmem:[%s1254_s23 + $0x98] sm:$0xff] %v525_v55  ;;  %v528_v4 = vadd.f32 %v464_v57, %v335_v56  ;;  %v466_v5 = vmul.f32 %v1226_v13, %v401_v52  ;;  %v338_v6 = vmul.f32 %v1220_v8, %v273_v53  ;;  %v412_v44 = vld [vmem:[%s1206_s22 + $0x118] sm:$0xff]  ;;  %v413_v50 = vld [vmem:[%s1206_s22 + $0x120] sm:$0xff]  ;;  %v414_v52 = vld [vmem:[%s1206_s22 + $0x128] sm:$0xff] }
  0x73   : > { %v467_v7 = vmul.f32 %v1226_v13, %v402_v54  ;;  %590 = vst [vmem:[%s1254_s23 + $0xa0] sm:$0xff] %v526_v62  ;;  %591 = vst [vmem:[%s1254_s23 + $0xa8] sm:$0xff] %v527_v63  ;;  %v529_v12 = vadd.f32 %v465_v0, %v336_v58  ;;  %v339_v14 = vmul.f32 %v1220_v8, %v274_v59  ;;  %v286_v57 = vld [vmem:[%s1198_s19 + $0x130] sm:$0xff]  ;;  %v287_v59 = vld [vmem:[%s1198_s19 + $0x138] sm:$0xff] }
  0x74   : > { %v468_v15 = vmul.f32 %v1226_v13, %v403_v60  ;;  %v340_v16 = vmul.f32 %v1220_v8, %v275_v61  ;;  %592 = vst [vmem:[%s1254_s23 + $0xb0] sm:$0xff] %v528_v4  ;;  %v530_v20 = vadd.f32 %v466_v5, %v337_v1  ;;  %v469_v22 = vmul.f32 %v1226_v13, %v404_v2  ;;  %v415_v58 = vld [vmem:[%s1206_s22 + $0x130] sm:$0xff]  ;;  %v416_v0 = vld [vmem:[%s1206_s22 + $0x138] sm:$0xff]  ;;  %v288_v1 = vld [vmem:[%s1198_s19 + $0x140] sm:$0xff] }
  0x75   : > { %v531_v21 = vadd.f32 %v467_v7, %v338_v6  ;;  %v341_v23 = vmul.f32 %v1220_v8, %v276_v3  ;;  %593 = vst [vmem:[%s1254_s23 + $0xb8] sm:$0xff] %v529_v12  ;;  %v470_v27 = vmul.f32 %v1226_v13, %v405_v9  ;;  %v342_v28 = vmul.f32 %v1220_v8, %v277_v10  ;;  %v417_v6 = vld [vmem:[%s1206_s22 + $0x140] sm:$0xff]  ;;  %v289_v7 = vld [vmem:[%s1198_s19 + $0x148] sm:$0xff] }
  0x76   : > { %v532_v26 = vadd.f32 %v468_v15, %v339_v14  ;;  %v471_v29 = vmul.f32 %v1226_v13, %v406_v11  ;;  %594 = vst [vmem:[%s1254_s23 + $0xc0] sm:$0xff] %v530_v20  ;;  %v533_v33 = vadd.f32 %v469_v22, %v340_v16  ;;  %v343_v34 = vmul.f32 %v1220_v8, %v278_v17  ;;  %v418_v9 = vld [vmem:[%s1206_s22 + $0x148] sm:$0xff]  ;;  %v290_v15 = vld [vmem:[%s1198_s19 + $0x150] sm:$0xff]  ;;  %v291_v17 = vld [vmem:[%s1198_s19 + $0x158] sm:$0xff] }
  0x77   : > { %595 = vst [vmem:[%s1254_s23 + $0xc8] sm:$0xff] %v531_v21  ;;  %v472_v35 = vmul.f32 %v1226_v13, %v407_v18  ;;  %v344_v36 = vmul.f32 %v1220_v8, %v279_v19  ;;  %v534_v40 = vadd.f32 %v470_v27, %v341_v23  ;;  %v473_v42 = vmul.f32 %v1226_v13, %v408_v24  ;;  %v419_v16 = vld [vmem:[%s1206_s22 + $0x150] sm:$0xff]  ;;  %v420_v22 = vld [vmem:[%s1206_s22 + $0x158] sm:$0xff]  ;;  %v292_v23 = vld [vmem:[%s1198_s19 + $0x160] sm:$0xff] }
  0x78   : > { %596 = vst [vmem:[%s1254_s23 + $0xd0] sm:$0xff] %v532_v26  ;;  %v535_v41 = vadd.f32 %v471_v29, %v342_v28  ;;  %v345_v43 = vmul.f32 %v1220_v8, %v280_v25  ;;  %597 = vst [vmem:[%s1254_s23 + $0xd8] sm:$0xff] %v533_v33  ;;  %v474_v47 = vmul.f32 %v1226_v13, %v409_v30  ;;  %v421_v28 = vld [vmem:[%s1206_s22 + $0x160] sm:$0xff]  ;;  %v293_v29 = vld [vmem:[%s1198_s19 + $0x168] sm:$0xff] }
  0x79   : > { %v536_v46 = vadd.f32 %v472_v35, %v343_v34  ;;  %v346_v48 = vmul.f32 %v1220_v8, %v281_v31  ;;  %v475_v49 = vmul.f32 %v1226_v13, %v410_v32  ;;  %598 = vst [vmem:[%s1254_s23 + $0xe0] sm:$0xff] %v534_v40  ;;  %v537_v53 = vadd.f32 %v473_v42, %v344_v36  ;;  %v422_v30 = vld [vmem:[%s1206_s22 + $0x168] sm:$0xff]  ;;  %v294_v35 = vld [vmem:[%s1198_s19 + $0x170] sm:$0xff]  ;;  %v424_v42 = vld [vmem:[%s1206_s22 + $0x178] sm:$0xff] }
  0x7a   : > { %599 = vst [vmem:[%s1254_s23 + $0xe8] sm:$0xff] %v535_v41  ;;  %v347_v54 = vmul.f32 %v1220_v8, %v282_v37  ;;  %v476_v55 = vmul.f32 %v1226_v13, %v411_v38  ;;  %v348_v56 = vmul.f32 %v1220_v8, %v283_v39  ;;  %v538_v60 = vadd.f32 %v474_v47, %v345_v43  ;;  %v423_v36 = vld [vmem:[%s1206_s22 + $0x170] sm:$0xff]  ;;  %v295_v37 = vld [vmem:[%s1198_s19 + $0x178] sm:$0xff]  ;;  %v296_v43 = vld [vmem:[%s1198_s19 + $0x180] sm:$0xff] }
  0x7b   : > { %600 = vst [vmem:[%s1254_s23 + $0xf0] sm:$0xff] %v536_v46  ;;  %v539_v61 = vadd.f32 %v475_v49, %v346_v48  ;;  %v477_v62 = vmul.f32 %v1226_v13, %v412_v44  ;;  %v349_v63 = vmul.f32 %v1220_v8, %v284_v45  ;;  %601 = vst [vmem:[%s1254_s23 + $0xf8] sm:$0xff] %v537_v53  ;;  %v425_v48 = vld [vmem:[%s1206_s22 + $0x180] sm:$0xff]  ;;  %v297_v49 = vld [vmem:[%s1198_s19 + $0x188] sm:$0xff] }
  0x7c   : > { %v540_v2 = vadd.f32 %v476_v55, %v347_v54  ;;  %v478_v3 = vmul.f32 %v1226_v13, %v413_v50  ;;  %v350_v4 = vmul.f32 %v1220_v8, %v285_v51  ;;  %v479_v5 = vmul.f32 %v1226_v13, %v414_v52  ;;  %602 = vst [vmem:[%s1254_s23 + $0x100] sm:$0xff] %v538_v60  ;;  %v426_v50 = vld [vmem:[%s1206_s22 + $0x188] sm:$0xff]  ;;  %v298_v55 = vld [vmem:[%s1198_s19 + $0x190] sm:$0xff] }
  0x7d   : > { %603 = vst [vmem:[%s1254_s23 + $0x108] sm:$0xff] %v539_v61  ;;  %v541_v10 = vadd.f32 %v477_v62, %v348_v56  ;;  %v351_v11 = vmul.f32 %v1220_v8, %v286_v57  ;;  %v480_v12 = vmul.f32 %v1226_v13, %v415_v58  ;;  %v352_v14 = vmul.f32 %v1220_v8, %v287_v59  ;;  %v427_v56 = vld [vmem:[%s1206_s22 + $0x190] sm:$0xff]  ;;  %v299_v57 = vld [vmem:[%s1198_s19 + $0x198] sm:$0xff] }
  0x7e   : > { %604 = vst [vmem:[%s1254_s23 + $0x110] sm:$0xff] %v540_v2  ;;  %v542_v18 = vadd.f32 %v478_v3, %v349_v63  ;;  %v543_v19 = vadd.f32 %v479_v5, %v350_v4  ;;  %v481_v20 = vmul.f32 %v1226_v13, %v416_v0  ;;  %v353_v21 = vmul.f32 %v1220_v8, %v288_v1  ;;  %v428_v62 = vld [vmem:[%s1206_s22 + $0x198] sm:$0xff]  ;;  %v300_v63 = vld [vmem:[%s1198_s19 + $0x1a0] sm:$0xff]  ;;  %v301_v5 = vld [vmem:[%s1198_s19 + $0x1a8] sm:$0xff] }
  0x7f   : > { %605 = vst [vmem:[%s1254_s23 + $0x118] sm:$0xff] %v541_v10  ;;  %v544_v24 = vadd.f32 %v480_v12, %v351_v11  ;;  %v482_v25 = vmul.f32 %v1226_v13, %v417_v6  ;;  %v354_v26 = vmul.f32 %v1220_v8, %v289_v7  ;;  %v483_v27 = vmul.f32 %v1226_v13, %v418_v9  ;;  %v429_v4 = vld [vmem:[%s1206_s22 + $0x1a0] sm:$0xff]  ;;  %v430_v6 = vld [vmem:[%s1206_s22 + $0x1a8] sm:$0xff]  ;;  %v302_v12 = vld [vmem:[%s1198_s19 + $0x1b0] sm:$0xff] }
  0x80   : > { %606 = vst [vmem:[%s1254_s23 + $0x120] sm:$0xff] %v542_v18  ;;  %607 = vst [vmem:[%s1254_s23 + $0x128] sm:$0xff] %v543_v19  ;;  %v545_v31 = vadd.f32 %v481_v20, %v352_v14  ;;  %v355_v32 = vmul.f32 %v1220_v8, %v290_v15  ;;  %v484_v33 = vmul.f32 %v1226_v13, %v419_v16  ;;  %v431_v14 = vld [vmem:[%s1206_s22 + $0x1b0] sm:$0xff]  ;;  %v303_v15 = vld [vmem:[%s1198_s19 + $0x1b8] sm:$0xff] }
  0x81   : > { %v356_v34 = vmul.f32 %v1220_v8, %v291_v17  ;;  %608 = vst [vmem:[%s1254_s23 + $0x130] sm:$0xff] %v544_v24  ;;  %v546_v38 = vadd.f32 %v482_v25, %v353_v21  ;;  %v547_v39 = vadd.f32 %v483_v27, %v354_v26  ;;  %v485_v40 = vmul.f32 %v1226_v13, %v420_v22  ;;  %v432_v20 = vld [vmem:[%s1206_s22 + $0x1b8] sm:$0xff]  ;;  %v304_v21 = vld [vmem:[%s1198_s19 + $0x1c0] sm:$0xff]  ;;  %v305_v27 = vld [vmem:[%s1198_s19 + $0x1c8] sm:$0xff] }
  0x82   : > { %v357_v41 = vmul.f32 %v1220_v8, %v292_v23  ;;  %609 = vst [vmem:[%s1254_s23 + $0x138] sm:$0xff] %v545_v31  ;;  %v548_v44 = vadd.f32 %v484_v33, %v355_v32  ;;  %v486_v45 = vmul.f32 %v1226_v13, %v421_v28  ;;  %v358_v46 = vmul.f32 %v1220_v8, %v293_v29  ;;  %v433_v26 = vld [vmem:[%s1206_s22 + $0x1c0] sm:$0xff]  ;;  %v434_v28 = vld [vmem:[%s1206_s22 + $0x1c8] sm:$0xff]  ;;  %v306_v33 = vld [vmem:[%s1198_s19 + $0x1d0] sm:$0xff] }
  0x83   : > { %v487_v47 = vmul.f32 %v1226_v13, %v422_v30  ;;  %610 = vst [vmem:[%s1254_s23 + $0x140] sm:$0xff] %v546_v38  ;;  %611 = vst [vmem:[%s1254_s23 + $0x148] sm:$0xff] %v547_v39  ;;  %v549_v51 = vadd.f32 %v485_v40, %v356_v34  ;;  %v359_v52 = vmul.f32 %v1220_v8, %v294_v35  ;;  %v435_v34 = vld [vmem:[%s1206_s22 + $0x1d0] sm:$0xff]  ;;  %v307_v35 = vld [vmem:[%s1198_s19 + $0x1d8] sm:$0xff] }
  0x84   : > { %v488_v53 = vmul.f32 %v1226_v13, %v423_v36  ;;  %v360_v54 = vmul.f32 %v1220_v8, %v295_v37  ;;  %612 = vst [vmem:[%s1254_s23 + $0x150] sm:$0xff] %v548_v44  ;;  %v550_v58 = vadd.f32 %v486_v45, %v357_v41  ;;  %v489_v60 = vmul.f32 %v1226_v13, %v424_v42  ;;  %v436_v40 = vld [vmem:[%s1206_s22 + $0x1d8] sm:$0xff]  ;;  %v308_v41 = vld [vmem:[%s1198_s19 + $0x1e0] sm:$0xff] }
  0x85   : > { %v551_v59 = vadd.f32 %v487_v47, %v358_v46  ;;  %v361_v61 = vmul.f32 %v1220_v8, %v296_v43  ;;  %613 = vst [vmem:[%s1254_s23 + $0x158] sm:$0xff] %v549_v51  ;;  %v490_v1 = vmul.f32 %v1226_v13, %v425_v48  ;;  %v362_v2 = vmul.f32 %v1220_v8, %v297_v49  ;;  %v437_v46 = vld [vmem:[%s1206_s22 + $0x1e0] sm:$0xff]  ;;  %v309_v47 = vld [vmem:[%s1198_s19 + $0x1e8] sm:$0xff] }
  0x86   : > { %v552_v0 = vadd.f32 %v488_v53, %v359_v52  ;;  %v491_v3 = vmul.f32 %v1226_v13, %v426_v50  ;;  %614 = vst [vmem:[%s1254_s23 + $0x160] sm:$0xff] %v550_v58  ;;  %v553_v7 = vadd.f32 %v489_v60, %v360_v54  ;;  %v363_v9 = vmul.f32 %v1220_v8, %v298_v55  ;;  %v438_v48 = vld [vmem:[%s1206_s22 + $0x1e8] sm:$0xff]  ;;  %v310_v53 = vld [vmem:[%s1198_s19 + $0x1f0] sm:$0xff]  ;;  %v311_v55 = vld [vmem:[%s1198_s19 + $0x1f8] sm:$0xff] }
  0x87   : > { %615 = vst [vmem:[%s1254_s23 + $0x168] sm:$0xff] %v551_v59  ;;  %v492_v10 = vmul.f32 %v1226_v13, %v427_v56  ;;  %v364_v11 = vmul.f32 %v1220_v8, %v299_v57  ;;  %v554_v16 = vadd.f32 %v490_v1, %v361_v61  ;;  %v493_v18 = vmul.f32 %v1226_v13, %v428_v62  ;;  %v439_v54 = vld [vmem:[%s1206_s22 + $0x1f0] sm:$0xff]  ;;  %v440_v60 = vld [vmem:[%s1206_s22 + $0x1f8] sm:$0xff] }
  0x88   : > { %616 = vst [vmem:[%s1254_s23 + $0x170] sm:$0xff] %v552_v0  ;;  %v555_v17 = vadd.f32 %v491_v3, %v362_v2  ;;  %v365_v19 = vmul.f32 %v1220_v8, %v300_v63  ;;  %617 = vst [vmem:[%s1254_s23 + $0x178] sm:$0xff] %v553_v7  ;;  %v494_v23 = vmul.f32 %v1226_v13, %v429_v4 }
  0x89   : > { %v556_v22 = vadd.f32 %v492_v10, %v363_v9  ;;  %v366_v24 = vmul.f32 %v1220_v8, %v301_v5  ;;  %v495_v25 = vmul.f32 %v1226_v13, %v430_v6  ;;  %618 = vst [vmem:[%s1254_s23 + $0x180] sm:$0xff] %v554_v16  ;;  %v557_v29 = vadd.f32 %v493_v18, %v364_v11 }
  0x8a   : > { %619 = vst [vmem:[%s1254_s23 + $0x188] sm:$0xff] %v555_v17  ;;  %v367_v30 = vmul.f32 %v1220_v8, %v302_v12  ;;  %v496_v31 = vmul.f32 %v1226_v13, %v431_v14  ;;  %v368_v32 = vmul.f32 %v1220_v8, %v303_v15  ;;  %v558_v36 = vadd.f32 %v494_v23, %v365_v19 }
  0x8b   : > { %620 = vst [vmem:[%s1254_s23 + $0x190] sm:$0xff] %v556_v22  ;;  %v559_v37 = vadd.f32 %v495_v25, %v366_v24  ;;  %v497_v38 = vmul.f32 %v1226_v13, %v432_v20  ;;  %v369_v39 = vmul.f32 %v1220_v8, %v304_v21  ;;  %621 = vst [vmem:[%s1254_s23 + $0x198] sm:$0xff] %v557_v29 }
  0x8c   : > { %v560_v42 = vadd.f32 %v496_v31, %v367_v30  ;;  %v498_v43 = vmul.f32 %v1226_v13, %v433_v26  ;;  %v370_v44 = vmul.f32 %v1220_v8, %v305_v27  ;;  %v499_v45 = vmul.f32 %v1226_v13, %v434_v28  ;;  %622 = vst [vmem:[%s1254_s23 + $0x1a0] sm:$0xff] %v558_v36 }
  0x8d   : > { %623 = vst [vmem:[%s1254_s23 + $0x1a8] sm:$0xff] %v559_v37  ;;  %v561_v49 = vadd.f32 %v497_v38, %v368_v32  ;;  %v371_v50 = vmul.f32 %v1220_v8, %v306_v33  ;;  %v500_v51 = vmul.f32 %v1226_v13, %v435_v34  ;;  %v372_v52 = vmul.f32 %v1220_v8, %v307_v35 }
  0x8e   : > { %624 = vst [vmem:[%s1254_s23 + $0x1b0] sm:$0xff] %v560_v42  ;;  %v562_v56 = vadd.f32 %v498_v43, %v369_v39  ;;  %v563_v57 = vadd.f32 %v499_v45, %v370_v44  ;;  %v501_v58 = vmul.f32 %v1226_v13, %v436_v40  ;;  %v373_v59 = vmul.f32 %v1220_v8, %v308_v41 }
  0x8f   : > { %625 = vst [vmem:[%s1254_s23 + $0x1b8] sm:$0xff] %v561_v49  ;;  %v564_v61 = vadd.f32 %v500_v51, %v371_v50  ;;  %v502_v62 = vmul.f32 %v1226_v13, %v437_v46  ;;  %v374_v63 = vmul.f32 %v1220_v8, %v309_v47  ;;  %v503_v0 = vmul.f32 %v1226_v13, %v438_v48 }
  0x90   : > { %626 = vst [vmem:[%s1254_s23 + $0x1c0] sm:$0xff] %v562_v56  ;;  %627 = vst [vmem:[%s1254_s23 + $0x1c8] sm:$0xff] %v563_v57  ;;  %v565_v1 = vadd.f32 %v501_v58, %v372_v52  ;;  %v375_v2 = vmul.f32 %v1220_v8, %v310_v53  ;;  %v504_v3 = vmul.f32 %v1226_v13, %v439_v54 }
  0x91   : > { %v376_v4 = vmul.f32 %v1220_v8, %v311_v55  ;;  %628 = vst [vmem:[%s1254_s23 + $0x1d0] sm:$0xff] %v564_v61  ;;  %v566_v5 = vadd.f32 %v502_v62, %v373_v59  ;;  %v567_v6 = vadd.f32 %v503_v0, %v374_v63  ;;  %v505_v7 = vmul.f32 %v1226_v13, %v440_v60 }
  0x92   : > { %629 = vst [vmem:[%s1254_s23 + $0x1d8] sm:$0xff] %v565_v1  ;;  %v568_v9 = vadd.f32 %v504_v3, %v375_v2 }
  0x93   : > { %630 = vst [vmem:[%s1254_s23 + $0x1e0] sm:$0xff] %v566_v5  ;;  %631 = vst [vmem:[%s1254_s23 + $0x1e8] sm:$0xff] %v567_v6  ;;  %v569_v8 = vadd.f32 %v505_v7, %v376_v4 }
  0x94   : > { %632 = vst [vmem:[%s1254_s23 + $0x1f0] sm:$0xff] %v568_v9 }
  0x95   : > { %633 = vst [vmem:[%s1254_s23 + $0x1f8] sm:$0xff] %v569_v8 }
  0x96   : > { %933 = shalt.err (!%p930_p10)
}
  0x97   : > { %s934_s29 = scalar_lea.hbm %s1540_s17, 8192  ;;  %s938_s26 = scalar_lea.hbm %s1592_s3, 16384 }
  0x98   : > { %p935_p6 = scmp.ne.s32.totalorder %s1540_s17, %s934_s29  ;;  %p939_p5 = scmp.lt.s32.totalorder %s1540_s17, %s1592_s3 }
  0x99   : > { %p940_p12 = scmp.lt.s32.totalorder %s938_s26, %s934_s29 }
  0x9a   : > { %p936_p11 = pnand %p935_p6, %p1606_p9 }
  0x9b   : > { %p941_p7 = por %p940_p12, %p939_p5 }
  0x9c   : > { %p937_p1 = pneg %p936_p11 }
  0x9e   : > { %p942_p13 = pnand %p941_p7, %p937_p1 }
  0xa0   : > { %945 = shalt.err (!%p942_p13)
}
  0xa1   : > { %s1000_s8 = smov 512   ;;  %s1001_s23 = smov 32  }
  0xa2   : > { %795 = dma.vmem_to_hbm [thread:$0]  (%p1606_p9), %s1542_s11, 8192, %s1540_s17, %s635_s4, %s1000_s8, %s1000_s8, %s1001_s23  }
  0xa3 PF: > { %s664_s10 = sand.u32 1, %s980_s12   ;;  %p1607_p2 = scmp.ne.s32.totalorder %s1599_s25, 0 }
  0xa4   : > { %p1608_p0 = scmp.ge.s32.totalorder %s992_s15, 2  ;;  %s665_s16 = scalar_lea.sflag [#allocation4], %s664_s10 }
  0xa6   : > { %p809_p3 = pnand %p1608_p0, %p1607_p2 }
  0xa8   : > { %p810_p4 = pneg %p809_p3 }
  0xaa   : > { %975 = dma.done.wait (%p810_p4), %s665_s16, 8192  }
  0xab   : > { %977 = vsyncadd (%p810_p4), %s665_s16, 4294959104  ;;  %p20_p8 = scmp.ge.s32.totalorder %s1047_s18, 4   ;;  %s1609_s12 = smov %s984_s13 }
  0xac   : > { %s1610_s13 = smov %s988_s14  ;;  %s1611_s14 = smov %s1059_s21 }
  0xad   : > { %s1612_s15 = smov %s1047_s18  ;;  %22 = sbr.rel (!%p20_p8) target bundleno = 8 (0x8), region = 95 }
  0xb2   :  { %670 = vsyncpa [#allocation3], 1 }
  0xb3   :  { %672 = vsyncpa [#allocation3 + $0x1], 1 }
  0xb4   :  { %673 = vsyncpa [#allocation8], 1 }
  0xb5   :  { %675 = vsyncpa [#allocation8 + $0x1], 1 }
  0xb6   :  { %676 = vsyncpa [#allocation4], 1 }
  0xb7   :  { %678 = vsyncpa [#allocation4 + $0x1], 1 }
  0xb8   :  { %679 = vsyncpa [#allocation5], 1 }
  0xb9   :  { %681 = vsyncpa [#allocation5 + $0x1], 1 }

</bundles_post_ra>
